<compile_context>
chip_gen: v5e
topology: v5e:2x2
jax: 0.10.0
libtpu: 0.0.40
codegen_flags: <defaults>
</compile_context>

<pallas_src>
import functools

import jax
import jax.numpy as jnp
from jax.experimental import pallas as pl
from jax.experimental.pallas import tpu as pltpu


def _round_up(a, m):
    return ((a + m - 1) // m) * m


# --------------------------------------------------------------------------- #
# Pass 1: linear (MXU) + accumulation of per-channel batch statistics.
# --------------------------------------------------------------------------- #
def _linear_stats_kernel(x_ref, w_ref, b_ref, y_ref, stats_ref, *,
                         n_valid, block_n, mask_tail):
    @pl.when(pl.program_id(0) == 0)
    def _init():
        stats_ref[...] = jnp.zeros_like(stats_ref)

    # y = x @ W.T + b : contract the shared C_in axis directly; weight stays in
    # its native (C_out, C_in) layout (no per-call transpose in the wrapper).
    y = jax.lax.dot_general(
        x_ref[...], w_ref[...],
        dimension_numbers=(((1,), (1,)), ((), ())),
        preferred_element_type=jnp.float32)
    y = y + b_ref[...]
    y_ref[...] = y

    # Exclude zero-padded tail rows from the batch statistics.
    if mask_tail:
        row = (pl.program_id(0) * block_n
               + jax.lax.broadcasted_iota(jnp.int32, (block_n, 1), 0))
        ym = jnp.where(row < n_valid, y, 0.0)
    else:
        ym = y

    stats_ref[...] += jnp.concatenate(
        [jnp.sum(ym, axis=0, keepdims=True),
         jnp.sum(ym * ym, axis=0, keepdims=True)], axis=0)


# --------------------------------------------------------------------------- #
# Pass 2: folded BN apply + SiLU + dropout.
# --------------------------------------------------------------------------- #
def _bn_silu_dropout_kernel(y_ref, ss_ref, *rest, p, apply_dropout):
    if apply_dropout:
        u_ref, o_ref = rest
    else:
        (o_ref,) = rest

    y = y_ref[...]
    scale = ss_ref[0:1, :]          # (1, C_out)
    shift = ss_ref[1:2, :]          # (1, C_out)
    z = y * scale + shift           # folded BN: 2 ops/element

    # SiLU: z * sigmoid(z).
    # TODO(synk): on real TPU, pl.reciprocal(1 + exp(-z), approx=True) would move
    # the divide onto the otherwise-idle EUP; plain divide kept for portability
    # (interpret-mode testing) since this kernel is not VALU-bound at these sizes.
    act = z * (1.0 / (1.0 + jnp.exp(-z)))

    if apply_dropout:
        inv_keep = 1.0 / (1.0 - p)
        act = jnp.where(u_ref[...] < p, 0.0, act * inv_keep)

    o_ref[...] = act.astype(o_ref.dtype)


# --------------------------------------------------------------------------- #
# Wrapper
# --------------------------------------------------------------------------- #
def my_linear_bn_1d(x, weight, bias, gamma, beta, dropout_key=None, *,
                    p=0.15, eps=1e-5, training=True, block_n=1024):
    """x: (N, C_in) f32; weight: (C_out, C_in); bias/gamma/beta: (C_out,)."""
    n, c_in = x.shape
    c_out, c_in_w = weight.shape
    assert c_in_w == c_in

    x = x.astype(jnp.float32)
    weight = weight.astype(jnp.float32)

    # Batch tile: multiple of 8 sublanes; modest size that fits comfortably in
    # scoped VMEM (with double buffering) on v5e/v6e (128 MiB) AND v7x (64 MiB).
    # NOTE: for large realistic layers, cast x/W to bf16 (f32 accumulation) to
    # hit the native MXU path on v6e/v7x; kept f32 here to match PyTorch numerics.
    bn_rows = max(8, (min(block_n, _round_up(n, 8)) // 8) * 8)
    padded_n = _round_up(n, bn_rows)
    if padded_n != n:
        x = jnp.pad(x, ((0, padded_n - n), (0, 0)))
    n_tiles = padded_n // bn_rows

    b2 = bias.reshape(1, c_out).astype(jnp.float32)

    # -------------------- pass 1: linear + batch statistics ------------------ #
    y, stats = pl.pallas_call(
        functools.partial(_linear_stats_kernel, n_valid=n, block_n=bn_rows,
                          mask_tail=(padded_n != n)),
        grid=(n_tiles,),
        in_specs=[
            pl.BlockSpec((bn_rows, c_in), lambda i: (i, 0)),    # x tile
            pl.BlockSpec((c_out, c_in), lambda i: (0, 0)),      # weight (resident)
            pl.BlockSpec((1, c_out), lambda i: (0, 0)),         # bias (resident)
        ],
        out_specs=(
            pl.BlockSpec((bn_rows, c_out), lambda i: (i, 0)),   # y tile
            pl.BlockSpec((2, c_out), lambda i: (0, 0)),         # stats accumulator
        ),
        out_shape=(
            jax.ShapeDtypeStruct((padded_n, c_out), jnp.float32),
            jax.ShapeDtypeStruct((2, c_out), jnp.float32),
        ),
        compiler_params=pltpu.CompilerParams(
            # stats output is resident across the N tiles -> reduction axis.
            dimension_semantics=("arbitrary",),
            vmem_limit_bytes=32 * 1024 * 1024),
        cost_estimate=pl.CostEstimate(
            flops=2 * padded_n * c_in * c_out,
            transcendentals=0,
            bytes_accessed=4 * (padded_n * c_in + c_out * c_in + c_out
                                + padded_n * c_out + 2 * c_out)),
    )(x, weight, b2)

    # ------- fold BN affine into per-channel scale/shift (tiny, done once) --- #
    mean = stats[0] / n
    var = jnp.maximum(stats[1] / n - mean * mean, 0.0)   # biased var (training BN)
    scale = gamma.astype(jnp.float32) * jax.lax.rsqrt(var + eps)
    shift = beta.astype(jnp.float32) - mean * scale
    scale_shift = jnp.stack([scale, shift], axis=0)      # (2, C_out), single input

    # -------------------- pass 2: BN apply + SiLU + dropout ------------------ #
    apply_dropout = bool(training) and p > 0.0
    operands = [y, scale_shift]
    in_specs = [
        pl.BlockSpec((bn_rows, c_out), lambda i: (i, 0)),
        pl.BlockSpec((2, c_out), lambda i: (0, 0)),
    ]
    if apply_dropout:
        if dropout_key is None:
            dropout_key = jax.random.PRNGKey(0)
        # Per-tile independent dropout mask, generated with a portable PRNG.
        u = jax.random.uniform(dropout_key, (padded_n, c_out), jnp.float32)
        operands.append(u)
        in_specs.append(pl.BlockSpec((bn_rows, c_out), lambda i: (i, 0)))

    out = pl.pallas_call(
        functools.partial(_bn_silu_dropout_kernel, p=p,
                          apply_dropout=apply_dropout),
        grid=(n_tiles,),
        in_specs=in_specs,
        out_specs=pl.BlockSpec((bn_rows, c_out), lambda i: (i, 0)),
        out_shape=jax.ShapeDtypeStruct((padded_n, c_out), jnp.float32),
        compiler_params=pltpu.CompilerParams(
            dimension_semantics=("parallel",),
            vmem_limit_bytes=32 * 1024 * 1024),
        cost_estimate=pl.CostEstimate(
            flops=8 * padded_n * c_out,
            transcendentals=padded_n * c_out,
            bytes_accessed=4 * padded_n * c_out * (2 + (1 if apply_dropout else 0))
                           + 4 * 2 * c_out),
    )(*operands)

    return out[:n]


if __name__ == "__main__":
    # Small shapes consistent with the module: batch=8, in=32, out=128.
    N, C_IN, C_OUT = 8, 32, 128

    key = jax.random.PRNGKey(0)
    k_x, k_w, k_b, k_drop = jax.random.split(key, 4)

    # PyTorch nn.Linear default init: U(-1/sqrt(in), 1/sqrt(in)).
    bound = 1.0 / (C_IN ** 0.5)
    weight = jax.random.uniform(k_w, (C_OUT, C_IN), jnp.float32, -bound, bound)
    bias = jax.random.uniform(k_b, (C_OUT,), jnp.float32, -bound, bound)
    gamma = jnp.ones((C_OUT,), jnp.float32)   # BatchNorm1d weight
    beta = jnp.zeros((C_OUT,), jnp.float32)   # BatchNorm1d bias
    x = jax.random.normal(k_x, (N, C_IN), jnp.float32)

    # Training-mode forward (batch-stat BN + SiLU + dropout p=0.15).
    out = my_linear_bn_1d(x, weight, bias, gamma, beta, k_drop,
                          p=0.15, training=True)
    jax.block_until_ready(out)
    assert out.shape == (N, C_OUT) and out.dtype == jnp.float32

    # Numerical sanity check with dropout disabled (BN still uses batch stats,
    # matching PyTorch training-mode math) against a pure-JAX reference.
    out_nodrop = my_linear_bn_1d(x, weight, bias, gamma, beta, None,
                                 p=0.0, training=True)
    y_ref = x @ weight.T + bias
    m = jnp.mean(y_ref, axis=0)
    v = jnp.mean((y_ref - m) ** 2, axis=0)
    z_ref = (y_ref - m) / jnp.sqrt(v + 1e-5) * gamma + beta
    ref = z_ref * jax.nn.sigmoid(z_ref)
    max_err = float(jnp.max(jnp.abs(out_nodrop - ref)))
    assert jnp.allclose(out_nodrop, ref, rtol=2e-3, atol=2e-3), max_err

    print("KERNEL_OK")
</pallas_src>

<mosaic_0001>
module attributes {stable_mosaic.version = 11 : i64} {
  func.func @_linear_stats_kernel(%arg0: i32, %arg1: memref<8x32xf32, #tpu.memory_space<vmem>>, %arg2: memref<128x32xf32, #tpu.memory_space<vmem>>, %arg3: memref<1x128xf32, #tpu.memory_space<vmem>>, %arg4: memref<8x128xf32, #tpu.memory_space<vmem>>, %arg5: memref<2x128xf32, #tpu.memory_space<vmem>>) attributes {dimension_semantics = [#tpu.dimension_semantics<arbitrary>], iteration_bounds = array<i64: 1>, scalar_prefetch = 0 : i64, scratch_operands = 0 : i64, tpu.core_type = #tpu.core_type<tc>, window_params = [{transform_indices = @transform_0, window_bounds = array<i64: 8, 32>}, {pipeline_mode = #tpu.pipeline_mode<synchronous>, transform_indices = @transform_1, window_bounds = array<i64: 128, 32>}, {pipeline_mode = #tpu.pipeline_mode<synchronous>, transform_indices = @transform_2, window_bounds = array<i64: 1, 128>}, {transform_indices = @transform_3, window_bounds = array<i64: 8, 128>}, {pipeline_mode = #tpu.pipeline_mode<synchronous>, transform_indices = @transform_4, window_bounds = array<i64: 2, 128>}]} {
    %c0_i32 = arith.constant 0 : i32
    %0 = arith.cmpi eq, %arg0, %c0_i32 : i32
    %1 = arith.extui %0 : i1 to i32
    %c0_i32_0 = arith.constant 0 : i32
    %2 = arith.cmpi ne, %1, %c0_i32_0 : i32
    scf.if %2 {
      %cst_14 = arith.constant 0.000000e+00 : f32
      %19 = vector.broadcast %cst_14 : f32 to vector<2x128xf32>
      %c0_15 = arith.constant 0 : index
      %c0_16 = arith.constant 0 : index
      %20 = vector.load %arg5[%c0_15, %c0_16] : memref<2x128xf32, #tpu.memory_space<vmem>>, vector<2x128xf32>
      tpu.vector_store %arg5[%c0_15, %c0_16], %19 {strides = array<i32>} : memref<2x128xf32, #tpu.memory_space<vmem>>, vector<2x128xf32>,
    } else {
    }
    %c0 = arith.constant 0 : index
    %c0_1 = arith.constant 0 : index
    %3 = vector.load %arg1[%c0, %c0_1] : memref<8x32xf32, #tpu.memory_space<vmem>>, vector<8x32xf32>
    %c0_2 = arith.constant 0 : index
    %c0_3 = arith.constant 0 : index
    %4 = vector.load %arg2[%c0_2, %c0_3] : memref<128x32xf32, #tpu.memory_space<vmem>>, vector<128x32xf32>
    %cst = arith.constant dense<0.000000e+00> : vector<8x128xf32>
    %5 = tpu.matmul %3, %4, %cst {dimension_numbers = #tpu.dot_dimension_numbers<[1], [1], [0], [0], [0, 0, 1, 0], [], []>} : vector<8x32xf32>, vector<128x32xf32>, vector<8x128xf32> -> vector<8x128xf32>
    %c0_4 = arith.constant 0 : index
    %c0_5 = arith.constant 0 : index
    %6 = vector.load %arg3[%c0_4, %c0_5] : memref<1x128xf32, #tpu.memory_space<vmem>>, vector<1x128xf32>
    %7 = vector.broadcast %6 : vector<1x128xf32> to vector<8x128xf32>
    %8 = arith.addf %5, %7 : vector<8x128xf32>
    %c0_6 = arith.constant 0 : index
    %c0_7 = arith.constant 0 : index
    %9 = vector.load %arg4[%c0_6, %c0_7] : memref<8x128xf32, #tpu.memory_space<vmem>>, vector<8x128xf32>
    tpu.vector_store %arg4[%c0_6, %c0_7], %8 {strides = array<i32>} : memref<8x128xf32, #tpu.memory_space<vmem>>, vector<8x128xf32>,
    %c0_8 = arith.constant 0 : index
    %c0_9 = arith.constant 0 : index
    %10 = vector.load %arg5[%c0_8, %c0_9] : memref<2x128xf32, #tpu.memory_space<vmem>>, vector<2x128xf32>
    %cst_10 = arith.constant dense<0.000000e+00> : vector<128xf32>
    %11 = vector.multi_reduction <add>, %8, %cst_10 [0] : vector<8x128xf32> to vector<128xf32>
    %12 = vector.shape_cast %11 : vector<128xf32> to vector<1x128xf32>
    %13 = arith.mulf %8, %8 : vector<8x128xf32>
    %cst_11 = arith.constant dense<0.000000e+00> : vector<128xf32>
    %14 = vector.multi_reduction <add>, %13, %cst_11 [0] : vector<8x128xf32> to vector<128xf32>
    %15 = vector.shape_cast %14 : vector<128xf32> to vector<1x128xf32>
    %16 = tpu.concatenate %12, %15 in 0 : vector<1x128xf32>, vector<1x128xf32> -> vector<2x128xf32>
    %17 = arith.addf %10, %16 : vector<2x128xf32>
    %c0_12 = arith.constant 0 : index
    %c0_13 = arith.constant 0 : index
    %18 = vector.load %arg5[%c0_12, %c0_13] : memref<2x128xf32, #tpu.memory_space<vmem>>, vector<2x128xf32>
    tpu.vector_store %arg5[%c0_12, %c0_13], %17 {strides = array<i32>} : memref<2x128xf32, #tpu.memory_space<vmem>>, vector<2x128xf32>,
    return
  }
  func.func @transform_0(%arg0: i32) -> (i32, i32) {
    %c0_i32 = arith.constant 0 : i32
    %c0_i32_0 = arith.constant 0 : i32
    return %arg0, %c0_i32 : i32, i32
  }
  func.func @transform_1(%arg0: i32) -> (i32, i32) {
    %c0_i32 = arith.constant 0 : i32
    %c0_i32_0 = arith.constant 0 : i32
    %c0_i32_1 = arith.constant 0 : i32
    return %c0_i32, %c0_i32_0 : i32, i32
  }
  func.func @transform_2(%arg0: i32) -> (i32, i32) {
    %c0_i32 = arith.constant 0 : i32
    %c0_i32_0 = arith.constant 0 : i32
    %c0_i32_1 = arith.constant 0 : i32
    return %c0_i32, %c0_i32_0 : i32, i32
  }
  func.func @transform_3(%arg0: i32) -> (i32, i32) {
    %c0_i32 = arith.constant 0 : i32
    %c0_i32_0 = arith.constant 0 : i32
    return %arg0, %c0_i32 : i32, i32
  }
  func.func @transform_4(%arg0: i32) -> (i32, i32) {
    %c0_i32 = arith.constant 0 : i32
    %c0_i32_0 = arith.constant 0 : i32
    %c0_i32_1 = arith.constant 0 : i32
    return %c0_i32, %c0_i32_0 : i32, i32
  }
}

</mosaic_0001>

<bundles_post_ra>
// kernel: tpu_custom_call.1
= control target key start
LH: loop header
LB: loop body
LE: loop exit
PB: predicated region body
PF: predicated region fallthrough
CT: control target
= control target key end

     0   :  { %10 = vsyncpa [#allocation3], 0  ;;  %vm44_vm0 = vcmask 261120   ;;  %s345_s0 = inlined_call_operand.vmem [shape: f32[8,32], index: 0, kind: input, shape index: {}]   ;;  %s346_s1 = inlined_call_operand.vmem [shape: f32[128,32], index: 1, kind: input, shape index: {}]   ;;  %s347_s2 = inlined_call_operand.vmem [shape: f32[1,128], index: 2, kind: input, shape index: {}]   ;;  %s348_s3 = inlined_call_operand.hbm [shape: f32[8,128], index: 3, kind: output, shape index: {0}]   ;;  %s349_s4 = inlined_call_operand.hbm [shape: f32[2,128], index: 4, kind: output, shape index: {1}]  }
   0x1   :  { %v39_v0 = vld [vmem:[%s346_s1 + $0x78] sm:$0xff]  ;;  %v38_v1 = vld [vmem:[%s346_s1 + $0x70] sm:$0xff] }
   0x2   :  { %167 = vmatpush.xpose.msk.msra.mxu0 %vm44_vm0, %v39_v0 }
   0x3   :  { %11 = vsyncpa [#allocation5], 0  ;;  %v37_v2 = vld [vmem:[%s346_s1 + $0x68] sm:$0xff]  ;;  %v36_v3 = vld [vmem:[%s346_s1 + $0x60] sm:$0xff]  ;;  %v240_v17 = vmov 0.0   ;;  %s241_s25 = smov [#allocation2]  }
   0x4   :  { %v35_v4 = vld [vmem:[%s346_s1 + $0x58] sm:$0xff]  ;;  %v34_v5 = vld [vmem:[%s346_s1 + $0x50] sm:$0xff]  ;;  %v33_v6 = vld [vmem:[%s346_s1 + $0x48] sm:$0xff]  ;;  %22 = vst [vmem:[#allocation4] sm:$0x3] %v240_v17  ;;  %s140_s26 = sshll.u32 %s241_s25, 4  ;;  %s141_s26 = int_to_ptr.vmem [resolvable:$true] %s140_s26 }
   0x5   :  { %v32_v7 = vld [vmem:[%s346_s1 + $0x40] sm:$0xff]  ;;  %v31_v8 = vld [vmem:[%s346_s1 + $0x38] sm:$0xff]  ;;  %v30_v9 = vld [vmem:[%s346_s1 + $0x30] sm:$0xff]  ;;  %vm131_vm1 = vcmask 1040384   ;;  %s153_s30 = sshll.u32 %s349_s4, 4  ;;  %s154_s30 = int_to_ptr.hbm [resolvable:$true] %s153_s30 }
   0x6   :  { %168 = vmatpush.xpose.msk.msra.mxu0 %vm44_vm0, %v38_v1  ;;  %v29_v10 = vld [vmem:[%s346_s1 + $0x28] sm:$0xff]  ;;  %v28_v11 = vld [vmem:[%s346_s1 + $0x20] sm:$0xff]  ;;  %v27_v12 = vld [vmem:[%s346_s1 + $0x18] sm:$0xff] }
   0x7   :  { %v26_v13 = vld [vmem:[%s346_s1 + $0x10] sm:$0xff]  ;;  %v25_v14 = vld [vmem:[%s346_s1 + $0x8] sm:$0xff]  ;;  %v24_v15 = vld [vmem:[%s346_s1] sm:$0xff]  ;;  %s142_s1 = sshll.u32 %s348_s3, 4  ;;  %s143_s1 = int_to_ptr.hbm [resolvable:$true] %s142_s1 }
   0x8   :  { %v23_v16 = vld [vmem:[%s345_s0] sm:$0xff]  ;;  %s242_s0 = smov [#allocation4]  }
   0x9   :  { %v187_v18 = vld [vmem:[%s347_s2] ss:$0 sm:$0xff]  ;;  %s151_s2 = sshll.u32 %s242_s0, 4  ;;  %s152_s2 = int_to_ptr.vmem [resolvable:$true] %s151_s2 }
   0xa   :  { %169 = vmatpush.xpose.msk.msra.mxu0 %vm44_vm0, %v37_v2 }
   0xb   :  { %v117_v32 = vld [vmem:[#allocation4] sm:$0x3] }
   0xe   :  { %170 = vmatpush.xpose.msk.msra.mxu0 %vm44_vm0, %v36_v3 }
  0x12   :  { %171 = vmatpush.xpose.msk.msra.mxu0 %vm44_vm0, %v35_v4 }
  0x16   :  { %172 = vmatpush.xpose.msk.msra.mxu0 %vm44_vm0, %v34_v5 }
  0x1a   :  { %173 = vmatpush.xpose.msk.msra.mxu0 %vm44_vm0, %v33_v6 }
  0x1e   :  { %174 = vmatpush.xpose.msk.msra.mxu0 %vm44_vm0, %v32_v7 }
  0x22   :  { %175 = vmatpush.xpose.msk.msra.mxu0 %vm44_vm0, %v31_v8 }
  0x26   :  { %176 = vmatpush.xpose.msk.msra.mxu0 %vm44_vm0, %v30_v9 }
  0x2a   :  { %177 = vmatpush.xpose.msk.msra.mxu0 %vm44_vm0, %v29_v10 }
  0x2e   :  { %178 = vmatpush.xpose.msk.msra.mxu0 %vm44_vm0, %v28_v11 }
  0x32   :  { %179 = vmatpush.xpose.msk.msra.mxu0 %vm44_vm0, %v27_v12 }
  0x36   :  { %180 = vmatpush.xpose.msk.msra.mxu0 %vm44_vm0, %v26_v13 }
  0x3a   :  { %181 = vmatpush.xpose.msk.msra.mxu0 %vm44_vm0, %v25_v14 }
  0x3e   :  { %182 = vmatpush.xpose.msk.msra.mxu0 %vm44_vm0, %v24_v15 }
  0x41   :  { %183 = vmatmul.msk.f32.vlgmr.msra.gmra.mxu0 %vm44_vm0, %v23_v16 }
  0xbe   :  { %v113_v19 = vpop.f32.mrf.mxu0 }
  0xbf   :  { %v114_v20 = vadd.f32 %v187_v18, %v113_v19 }
  0xc1   :  { %v118_v21 = vrot.slane %v114_v20, 4  ;;  %v124_v22 = vmul.f32 %v114_v20, %v114_v20  ;;  %116 = vst [vmem:[#allocation2] sm:$0xff] %v114_v20 }
  0xc2   :  { %145 = dma.vmem_to_hbm [thread:$0]  %s141_s26, 128, %s143_s1, [#allocation3]  }
  0xc3   :  { %v119_v23 = vadd.f32 %v118_v21, %v114_v20  ;;  %v125_v24 = vrot.slane %v124_v22, 4 }
  0xc5   :  { %v120_v25 = vrot.slane %v119_v23, 2  ;;  %v126_v26 = vadd.f32 %v125_v24, %v124_v22 }
  0xc7   :  { %v121_v27 = vadd.f32 %v120_v25, %v119_v23  ;;  %v127_v28 = vrot.slane %v126_v26, 2 }
  0xc9   :  { %v122_v29 = vrot.slane %v121_v27, 1  ;;  %v128_v30 = vadd.f32 %v127_v28, %v126_v26 }
  0xcb   :  { %v129_v31 = vrot.slane %v128_v30, 1  ;;  %v123_v33 = vadd.f32 %v122_v29, %v121_v27 }
  0xcd   :  { %v130_v34 = vadd.f32 %v129_v31, %v128_v30 }
  0xcf   :  { %v132_v35 = vsel %vm131_vm1, %v123_v33, %v130_v34 }
  0xd0   :  { %v133_v36 = vadd.f32 %v132_v35, %v117_v32 }
  0xd2   :  { %134 = vst [vmem:[#allocation4] sm:$0x3] %v133_v36 }
  0xd3   :  { %156 = dma.vmem_to_hbm [thread:$0]  %s152_s2, 32, %s154_s30, [#allocation5]  }
  0xd4   :  { %236 = dma.done.wait [#allocation3], 128  }
  0xd5   :  { %237 = vsyncadd [#allocation3], 4294967168 }
  0xd6   :  { %238 = dma.done.wait [#allocation5], 32  }
  0xd7   :  { %239 = vsyncadd [#allocation5], 4294967264 }
  0xd8   :  { %165 = vsyncpa [#allocation3], 1 }
  0xd9   :  { %166 = vsyncpa [#allocation5], 1 }

</bundles_post_ra>
